<compile_context>
chip_gen: v7x
topology: tpu7x:2x2x1
jax: 0.10.0
libtpu: 0.0.40
codegen_flags: <defaults>
</compile_context>

<pallas_src>
import jax
import jax.numpy as jnp
from jax.experimental import pallas as pl
from jax.experimental.pallas import tpu as pltpu


_ONE_THIRD = 1.0 / 3.0
_MIN_GRID_STEPS = 8          # enough steps for DMA/compute overlap + dual-TC split
_TINY_SLAB_BYTES = 1 << 20   # below this, one block is fine (per-step overhead wins)

_COMPILER_PARAMS = pltpu.CompilerParams(
    dimension_semantics=("parallel",),
    # 4 MiB blocks => 2 arrays x 2 buffers x 4 MiB = 16 MiB; set the scoped
    # limit to 32 MiB so v5e (16 MiB default) has headroom.  32 MiB is the
    # default on v6e/v7x and well under every generation's physical VMEM.
    vmem_limit_bytes=32 * 1024 * 1024,
)


def _cdiv(a: int, b: int) -> int:
    return -(-a // b)


def _hsigmoid_kernel(x_ref, o_ref):
    # relu6(x + 3) / 3 == clamp(x + 3, 0, 6) * (1/3), computed in f32 so that
    # bf16 inputs don't see a badly rounded 1/3 constant.
    xf = x_ref[...].astype(jnp.float32)
    y = jnp.clip(xf + 3.0, 0.0, 6.0) * _ONE_THIRD
    o_ref[...] = y.astype(o_ref.dtype)


def _choose_cols(n: int):
    """Largest lane-dense column width (multiple of 128) dividing n, or None."""
    for c in (1024, 512, 256, 128):
        if n % c == 0:
            return c
    return None


def _pick_block_rows(rows: int, cols: int, itemsize: int, target_block_bytes: int) -> int:
    """Row tile: <= target_block_bytes per block, >= _MIN_GRID_STEPS grid steps
    (even when cheap) for any slab bigger than ~1 MiB."""
    sub = max(8, 32 // itemsize)              # sublane multiple: f32->8, bf16->16, i8->32
    slab_bytes = rows * cols * itemsize
    if slab_bytes <= _TINY_SLAB_BYTES or rows < 2 * sub:
        return rows                           # tiny slab: single full-extent block
    row_bytes = cols * itemsize
    br_cap = max(sub, (target_block_bytes // row_bytes) // sub * sub)
    br_steps = max(sub, (rows // _MIN_GRID_STEPS) // sub * sub)
    br = min(br_cap, br_steps, rows)
    # Prefer an even number of grid steps so v7x's 2 TensorCores get equal work.
    steps = _cdiv(rows, br)
    if steps > 1 and steps % 2 == 1:
        br_even = _cdiv(_cdiv(rows, steps + 1), sub) * sub
        if sub <= br_even <= br_cap and _cdiv(rows, br_even) % 2 == 0:
            br = br_even
    return br


def _hsigmoid_2d(x2d: jax.Array, target_block_bytes: int, donate: bool) -> jax.Array:
    """Elementwise kernel over a lane-dense (rows, cols) slab, cols % 128 == 0."""
    rows, cols = x2d.shape
    itemsize = jnp.dtype(x2d.dtype).itemsize
    block_rows = _pick_block_rows(rows, cols, itemsize, target_block_bytes)
    grid = (pl.cdiv(rows, block_rows),)
    return pl.pallas_call(
        _hsigmoid_kernel,
        out_shape=jax.ShapeDtypeStruct((rows, cols), x2d.dtype),
        grid=grid,
        in_specs=[pl.BlockSpec((block_rows, cols), lambda i: (i, 0))],
        out_specs=pl.BlockSpec((block_rows, cols), lambda i: (i, 0)),
        compiler_params=_COMPILER_PARAMS,
        input_output_aliases=({0: 0} if donate else {}),
    )(x2d)


def _hsigmoid_1d(x_flat: jax.Array, target_block_bytes: int, donate: bool) -> jax.Array:
    """Unaligned sizes: one 1-D pallas_call over the flat array.  Pallas masks
    the ragged last block, so there is no pad / slice / concatenate copy."""
    n = x_flat.shape[0]
    itemsize = jnp.dtype(x_flat.dtype).itemsize
    lane_blk = 1024                           # 8 sublanes * 128 lanes
    # Conservative per-block cap for 1-D layouts (512 Ki elements max).
    blk_cap = min(target_block_bytes // itemsize, 128 * 1024)
    blk_cap = max(lane_blk, blk_cap // lane_blk * lane_blk)
    # Keep >= ~_MIN_GRID_STEPS steps once the array is big enough to pipeline.
    blk_steps = max(lane_blk, (n // _MIN_GRID_STEPS) // lane_blk * lane_blk)
    blk = min(blk_cap, blk_steps)
    grid = (pl.cdiv(n, blk),)
    return pl.pallas_call(
        _hsigmoid_kernel,
        out_shape=jax.ShapeDtypeStruct((n,), x_flat.dtype),
        grid=grid,
        in_specs=[pl.BlockSpec((blk,), lambda i: (i,))],
        out_specs=pl.BlockSpec((blk,), lambda i: (i,)),
        compiler_params=_COMPILER_PARAMS,
        input_output_aliases=({0: 0} if donate else {}),
    )(x_flat)


def hsigmoid(x: jax.Array, *,
             target_block_bytes: int = 4 * 1024 * 1024,
             donate: bool = False) -> jax.Array:
    """Elementwise Hsigmoid = relu6(x + 3) / 3, any shape, float dtype."""
    orig_shape = x.shape
    n = x.size
    if n == 0:
        return x

    x_flat = x.reshape(-1)

    cols = _choose_cols(n)
    if cols is not None:
        # Fast path: free reshape to a lane-dense 2-D slab, no extra copies.
        rows = n // cols
        out2d = _hsigmoid_2d(x_flat.reshape(rows, cols), target_block_bytes, donate)
        return out2d.reshape(orig_shape)

    if n < 1024:
        # Trivially small + unaligned: a single fused XLA elementwise op is
        # already optimal (one read + one write).
        return jnp.clip(x + 3.0, 0.0, 6.0) / 3.0

    # Unaligned: in-kernel ragged tail (masked last block), one full-size output.
    out = _hsigmoid_1d(x_flat, target_block_bytes, donate)
    return out.reshape(orig_shape)


if __name__ == "__main__":
    key = jax.random.PRNGKey(0)
    k1, k2, k3 = jax.random.split(key, 3)

    def ref(v):
        return jnp.clip(v + 3.0, 0.0, 6.0) / 3.0

    # 1) Primary: small NCHW activation (batch=2, channels=4, 16x16).
    #    2*4*16*16 = 2048 -> copy-free 2-D fast path (cols=1024).
    x1 = jax.random.normal(k1, (2, 4, 16, 16), dtype=jnp.float32) * 4.0
    y1 = jax.block_until_ready(hsigmoid(x1))
    assert y1.shape == x1.shape and y1.dtype == x1.dtype
    assert jnp.allclose(y1, ref(x1), atol=1e-6, rtol=1e-6)

    # 2) Larger aligned activation -> multi-step pipelined grid (8 even steps).
    x2 = jax.random.normal(k2, (8, 16, 64, 64), dtype=jnp.float32) * 4.0
    y2 = jax.block_until_ready(hsigmoid(x2))
    assert jnp.allclose(y2, ref(x2), atol=1e-6, rtol=1e-6)

    # 3) Unaligned size -> 1-D path with in-kernel masked ragged tail.
    x3 = jax.random.normal(k3, (3, 500, 1001), dtype=jnp.float32) * 4.0
    y3 = jax.block_until_ready(hsigmoid(x3))
    assert y3.shape == x3.shape and y3.dtype == x3.dtype
    assert jnp.allclose(y3, ref(x3), atol=1e-6, rtol=1e-6)

    # 4) Tiny unaligned -> fused-jnp fallback.
    x4 = jax.random.normal(jax.random.PRNGKey(1), (5, 7, 11), dtype=jnp.float32) * 4.0
    y4 = jax.block_until_ready(hsigmoid(x4))
    assert jnp.allclose(y4, ref(x4), atol=1e-6, rtol=1e-6)

    print("KERNEL_OK")
</pallas_src>

<mosaic_0001>
module attributes {stable_mosaic.version = 11 : i64} {
  func.func @_hsigmoid_kernel(%arg0: i32, %arg1: memref<2x1024xf32, #tpu.memory_space<vmem>>, %arg2: memref<2x1024xf32, #tpu.memory_space<vmem>>) attributes {dimension_semantics = [#tpu.dimension_semantics<parallel>], iteration_bounds = array<i64: 1>, scalar_prefetch = 0 : i64, scratch_operands = 0 : i64, tpu.core_type = #tpu.core_type<tc>, window_params = [{transform_indices = @transform_0, window_bounds = array<i64: 2, 1024>}, {transform_indices = @transform_1, window_bounds = array<i64: 2, 1024>}]} {
    %c0 = arith.constant 0 : index
    %c0_0 = arith.constant 0 : index
    %0 = vector.load %arg1[%c0, %c0_0] : memref<2x1024xf32, #tpu.memory_space<vmem>>, vector<2x1024xf32>
    %cst = arith.constant 3.000000e+00 : f32
    %1 = vector.broadcast %cst : f32 to vector<2x1024xf32>
    %2 = arith.addf %0, %1 : vector<2x1024xf32>
    %cst_1 = arith.constant 0.000000e+00 : f32
    %cst_2 = arith.constant 6.000000e+00 : f32
    %3 = vector.broadcast %cst_1 : f32 to vector<2x1024xf32>
    %4 = arith.maximumf %3, %2 : vector<2x1024xf32>
    %5 = vector.broadcast %cst_2 : f32 to vector<2x1024xf32>
    %6 = arith.minimumf %5, %4 : vector<2x1024xf32>
    %cst_3 = arith.constant 0.333333343 : f32
    %7 = vector.broadcast %cst_3 : f32 to vector<2x1024xf32>
    %8 = arith.mulf %6, %7 : vector<2x1024xf32>
    %c0_4 = arith.constant 0 : index
    %c0_5 = arith.constant 0 : index
    %9 = vector.load %arg2[%c0_4, %c0_5] : memref<2x1024xf32, #tpu.memory_space<vmem>>, vector<2x1024xf32>
    tpu.vector_store %arg2[%c0_4, %c0_5], %8 {strides = array<i32>} : memref<2x1024xf32, #tpu.memory_space<vmem>>, vector<2x1024xf32>,
    return
  }
  func.func @transform_0(%arg0: i32) -> (i32, i32) {
    %c0_i32 = arith.constant 0 : i32
    %c0_i32_0 = arith.constant 0 : i32
    return %arg0, %c0_i32 : i32, i32
  }
  func.func @transform_1(%arg0: i32) -> (i32, i32) {
    %c0_i32 = arith.constant 0 : i32
    %c0_i32_0 = arith.constant 0 : i32
    return %arg0, %c0_i32 : i32, i32
  }
}

</mosaic_0001>

<bundles_post_ra>
// kernel: tpu_custom_call.1
= control target key start
LH: loop header
LB: loop body
LE: loop exit
PB: predicated region body
PF: predicated region fallthrough
CT: control target
= control target key end

     0   :  { %6 = vsyncpa [#allocation3], 0  ;;  %s134_s0 = inlined_call_operand.hbm [shape: f32[2,1024], index: 0, kind: input, shape index: {}]   ;;  %s135_s1 = inlined_call_operand.hbm [shape: f32[2,1024], index: 1, kind: output, shape index: {}]  }
   0x1   :  { %7 = vsyncpa [#allocation4], 0  ;;  %s98_s6 = smov [#allocation2]   ;;  %s50_s10 = scalar_lea.hbm %s134_s0, 256 }
   0x2   :  { %s14_s7 = sshll.u32 %s98_s6, 4  ;;  %p51_p0 = scmp.ne.s32.totalorder %s134_s0, %s50_s10  ;;  %s15_s7 = int_to_ptr.vmem [resolvable:$true] %s14_s7 }
   0x3   :  { %p54_p1 = scmp.lt.u32.totalorder %s50_s10, %s134_s0 }
   0x5   :  { %p56_p2 = pnand %p54_p1, %p51_p0 }
   0x7   :  { %59 = shalt.err (!%p56_p2)
}
   0x8   :  { %s60_s15 = scalar_lea.vmem %s15_s7, 256  ;;  %p65_p4 = scmp.lt.s32.totalorder %s15_s7, %s15_s7 }
   0x9   :  { %p61_p3 = scmp.ne.s32.totalorder %s15_s7, %s60_s15  ;;  %p66_p5 = scmp.lt.s32.totalorder %s60_s15, %s60_s15 }
   0xb   :  { %p67_p6 = por %p66_p5, %p65_p4 }
   0xd   :  { %p68_p7 = pnand %p67_p6, %p61_p3 }
   0xf   :  { %71 = shalt.err (!%p68_p7)
}
  0x10   :  { %17 = dma.hbm_to_vmem [thread:$0]  %s134_s0, 256, %s15_s7, [#allocation3]  }
  0x11   :  { %94 = dma.done.wait [#allocation3], 256  }
  0x12   :  { %95 = vsyncadd [#allocation3], 4294967040  ;;  %v21_v0 = vld [vmem:[#allocation2] sm:$0xff]  ;;  %v22_v1 = vld [vmem:[#allocation2 + $0x8] sm:$0xff]  ;;  %s99_s18 = smov [#allocation5]  }
  0x13   :  { %v23_v2 = vadd.f32 3.0, %v21_v0  ;;  %v24_v3 = vadd.f32 3.0, %v22_v1  ;;  %s39_s19 = sshll.u32 %s99_s18, 4  ;;  %s40_s19 = int_to_ptr.vmem [resolvable:$true] %s39_s19 }
  0x14   :  { %s72_s20 = scalar_lea.vmem %s40_s19, 256  ;;  %p77_p9 = scmp.lt.s32.totalorder %s40_s19, %s40_s19 }
  0x15   :  { %v25_v4 = vmax.f32 %v23_v2, 0.0  ;;  %v26_v5 = vmax.f32 %v24_v3, 0.0  ;;  %p73_p8 = scmp.ne.s32.totalorder %s40_s19, %s72_s20  ;;  %p78_p10 = scmp.lt.s32.totalorder %s72_s20, %s72_s20 }
  0x17   :  { %v27_v6 = vmin.f32 %v25_v4, 6.0  ;;  %v28_v7 = vmin.f32 %v26_v5, 6.0  ;;  %p79_p11 = por %p78_p10, %p77_p9 }
  0x19   :  { %v29_v8 = vmul.f32 0.33333334, %v27_v6  ;;  %v30_v9 = vmul.f32 0.33333334, %v28_v7  ;;  %p80_p12 = pnand %p79_p11, %p73_p8 }
  0x1b   :  { %31 = vst [vmem:[#allocation5] sm:$0xff] %v29_v8  ;;  %32 = vst [vmem:[#allocation5 + $0x8] sm:$0xff] %v30_v9 }
  0x1c   :  { %83 = shalt.err (!%p80_p12)
}
  0x1d   :  { %s84_s22 = scalar_lea.hbm %s135_s1, 256 }
  0x1e   :  { %p85_p13 = scmp.ne.s32.totalorder %s135_s1, %s84_s22  ;;  %p88_p0 = scmp.lt.u32.totalorder %s84_s22, %s135_s1 }
  0x20   :  { %p90_p1 = pnand %p88_p0, %p85_p13 }
  0x22   :  { %93 = shalt.err (!%p90_p1)
}
  0x23   :  { %42 = dma.vmem_to_hbm [thread:$0]  %s40_s19, 256, %s135_s1, [#allocation4]  }
  0x24   :  { %96 = dma.done.wait [#allocation4], 256  }
  0x25   :  { %97 = vsyncadd [#allocation4], 4294967040 }
  0x26   :  { %46 = vsyncpa [#allocation3], 1 }
  0x27   :  { %47 = vsyncpa [#allocation4], 1 }

</bundles_post_ra>
